<compile_context>
chip_gen: v6e
topology: v6e:2x2x1
jax: 0.10.0
libtpu: 0.0.40
codegen_flags: <defaults>
</compile_context>

<pallas_src>
import jax
import jax.numpy as jnp
from jax.experimental import pallas as pl
from jax.experimental.pallas import tpu as pltpu


def _round_up(x, m):
    return (x + m - 1) // m * m


def _classifier_kernel(x_ref, w_ref, b_ref, o_ref):
    # In-kernel f32 -> bf16 cast (free: VALU slack), MXU matmul with f32 acc.
    x = x_ref[...].astype(jnp.bfloat16)
    h2y = jnp.dot(x, w_ref[...], preferred_element_type=jnp.float32)
    h2y = h2y + b_ref[...]                         # (tb, Op) + (1, Op) broadcast, f32
    o_ref[...] = jax.nn.sigmoid(h2y).astype(o_ref.dtype)   # lane-dense 128-wide store


def prepare_params(weight, bias, mxu_dtype=jnp.bfloat16):
    """weight: torch-Linear layout (O, H); bias: (O,).
    Returns (weight_t (H, Op) in mxu_dtype, bias (1, Op) f32).
    Only the output dim is padded (6 -> 128, lane-dense); K stays un-padded.
    Do this once per model, not per forward call."""
    O, H = weight.shape
    Op = _round_up(O, 128)                          # lane-dense output: 6 -> 128
    w_t = jnp.zeros((H, Op), mxu_dtype).at[:, :O].set(weight.T.astype(mxu_dtype))
    b = jnp.zeros((1, Op), jnp.float32).at[0, :O].set(bias.astype(jnp.float32))
    return w_t, b


def classifier_forward(prev_h, w_t_pad, b_pad, out_size, out_dtype=jnp.float32):
    """prev_h: (B, H) f32 -> (B, out_size) = sigmoid(prev_h @ W.T + b).

    prev_h is passed to the kernel un-padded and un-cast; all padding lives in
    the (once-prepared) weight/bias.  Set out_dtype=jnp.bfloat16 to halve the
    padded-output write traffic at large B (math stays f32; cast at store)."""
    B, H = prev_h.shape
    Hw, Op = w_t_pad.shape
    assert Hw == H, "weight was prepared for a different hidden size"

    # Batch tiling:
    #  * small B: one full-dim block (grid=(1,)), exact B rows -> no batch padding,
    #    post-kernel slice is lane-only.
    #  * larger B: split into ~2 tiles (rounded to 8 sublanes, capped at 512 rows)
    #    so the "parallel" axis has >=2 steps and v7x's second TensorCore engages;
    #    VMEM per tile is tiny (<1 MB) on every generation.
    if B <= 16:
        tb = B
    else:
        tb = min(512, _round_up((B + 1) // 2, 8))
    grid = (B + tb - 1) // tb

    out = pl.pallas_call(
        _classifier_kernel,
        out_shape=jax.ShapeDtypeStruct((B, Op), out_dtype),
        grid=(grid,),
        in_specs=[
            pl.BlockSpec((tb, H), lambda i: (i, 0)),    # f32 activations, full K=300
            pl.BlockSpec((H, Op), lambda i: (0, 0)),    # resident bf16 weight (300,128)
            pl.BlockSpec((1, Op), lambda i: (0, 0)),    # resident f32 bias (1,128)
        ],
        out_specs=pl.BlockSpec((tb, Op), lambda i: (i, 0)),
        compiler_params=pltpu.CompilerParams(
            dimension_semantics=("parallel",)),
    )(prev_h, w_t_pad, b_pad)

    # Drop output-column padding (lane-only slice; rows are already exact).
    return out[:, :out_size]


if __name__ == "__main__":
    # TorchOptions: d_rnn_size=300, r_rnn_size=0, dropout=0, init_weight=0.08
    hidden_size = 300          # opt.d_rnn_size + opt.r_rnn_size
    output_size = 6            # small synthetic number of classes
    batch = 8
    init_weight = 0.08

    key = jax.random.PRNGKey(0)
    k_x, k_w, k_b = jax.random.split(key, 3)

    # deterministic parameter init, matching init.uniform_(-0.08, 0.08)
    weight = jax.random.uniform(
        k_w, (output_size, hidden_size), jnp.float32,
        minval=-init_weight, maxval=init_weight)        # torch Linear weight (O, H)
    bias = jax.random.uniform(
        k_b, (output_size,), jnp.float32,
        minval=-init_weight, maxval=init_weight)

    prev_h = jax.random.normal(k_x, (batch, hidden_size), jnp.float32)

    # one-time parameter preparation (transpose + output-pad + bf16 cast)
    w_t_pad, b_pad = prepare_params(weight, bias)

    pred = classifier_forward(prev_h, w_t_pad, b_pad, output_size)
    pred = jax.block_until_ready(pred)
    assert pred.shape == (batch, output_size)

    # reference 1: identical bf16-matmul math in plain JAX (tight tolerance)
    ref_bf16 = jax.nn.sigmoid(
        jnp.dot(prev_h.astype(jnp.bfloat16), weight.T.astype(jnp.bfloat16),
                preferred_element_type=jnp.float32) + bias)
    assert jnp.allclose(pred, ref_bf16, atol=1e-4, rtol=1e-4)

    # reference 2: full-f32 PyTorch-equivalent math (bf16 MXU inputs => loose tol)
    ref_f32 = jax.nn.sigmoid(prev_h @ weight.T + bias)
    assert jnp.allclose(pred, ref_f32, atol=2e-2, rtol=2e-2)

    print("KERNEL_OK")
</pallas_src>

<mosaic_0001>
module attributes {stable_mosaic.version = 11 : i64} {
  func.func @_classifier_kernel(%arg0: i32, %arg1: memref<8x300xf32, #tpu.memory_space<vmem>>, %arg2: memref<300x128xbf16, #tpu.memory_space<vmem>>, %arg3: memref<1x128xf32, #tpu.memory_space<vmem>>, %arg4: memref<8x128xf32, #tpu.memory_space<vmem>>) attributes {dimension_semantics = [#tpu.dimension_semantics<parallel>], iteration_bounds = array<i64: 1>, scalar_prefetch = 0 : i64, scratch_operands = 0 : i64, tpu.core_type = #tpu.core_type<tc>, window_params = [{transform_indices = @transform_0, window_bounds = array<i64: 8, 300>}, {pipeline_mode = #tpu.pipeline_mode<synchronous>, transform_indices = @transform_1, window_bounds = array<i64: 300, 128>}, {pipeline_mode = #tpu.pipeline_mode<synchronous>, transform_indices = @transform_2, window_bounds = array<i64: 1, 128>}, {transform_indices = @transform_3, window_bounds = array<i64: 8, 128>}]} {
    %c0 = arith.constant 0 : index
    %c0_0 = arith.constant 0 : index
    %0 = vector.load %arg1[%c0, %c0_0] : memref<8x300xf32, #tpu.memory_space<vmem>>, vector<8x300xf32>
    %1 = arith.truncf %0 : vector<8x300xf32> to vector<8x300xbf16>
    %c0_1 = arith.constant 0 : index
    %c0_2 = arith.constant 0 : index
    %2 = vector.load %arg2[%c0_1, %c0_2] : memref<300x128xbf16, #tpu.memory_space<vmem>>, vector<300x128xbf16>
    %cst = arith.constant dense<0.000000e+00> : vector<8x128xf32>
    %3 = tpu.matmul %1, %2, %cst {dimension_numbers = #tpu.dot_dimension_numbers<[1], [0], [0], [1], [0, 0, 1, 1], [], []>} : vector<8x300xbf16>, vector<300x128xbf16>, vector<8x128xf32> -> vector<8x128xf32>
    %c0_3 = arith.constant 0 : index
    %c0_4 = arith.constant 0 : index
    %4 = vector.load %arg3[%c0_3, %c0_4] : memref<1x128xf32, #tpu.memory_space<vmem>>, vector<1x128xf32>
    %5 = vector.broadcast %4 : vector<1x128xf32> to vector<8x128xf32>
    %6 = arith.addf %3, %5 : vector<8x128xf32>
    %7 = arith.negf %6 : vector<8x128xf32>
    %8 = math.exp %7 : vector<8x128xf32>
    %cst_5 = arith.constant 1.000000e+00 : f32
    %9 = vector.broadcast %cst_5 : f32 to vector<8x128xf32>
    %10 = arith.addf %9, %8 : vector<8x128xf32>
    %11 = arith.divf %9, %10 : vector<8x128xf32>
    %c0_6 = arith.constant 0 : index
    %c0_7 = arith.constant 0 : index
    %12 = vector.load %arg4[%c0_6, %c0_7] : memref<8x128xf32, #tpu.memory_space<vmem>>, vector<8x128xf32>
    tpu.vector_store %arg4[%c0_6, %c0_7], %11 {strides = array<i32>} : memref<8x128xf32, #tpu.memory_space<vmem>>, vector<8x128xf32>,
    return
  }
  func.func @transform_0(%arg0: i32) -> (i32, i32) {
    %c0_i32 = arith.constant 0 : i32
    %c0_i32_0 = arith.constant 0 : i32
    return %arg0, %c0_i32 : i32, i32
  }
  func.func @transform_1(%arg0: i32) -> (i32, i32) {
    %c0_i32 = arith.constant 0 : i32
    %c0_i32_0 = arith.constant 0 : i32
    %c0_i32_1 = arith.constant 0 : i32
    return %c0_i32, %c0_i32_0 : i32, i32
  }
  func.func @transform_2(%arg0: i32) -> (i32, i32) {
    %c0_i32 = arith.constant 0 : i32
    %c0_i32_0 = arith.constant 0 : i32
    %c0_i32_1 = arith.constant 0 : i32
    return %c0_i32, %c0_i32_0 : i32, i32
  }
  func.func @transform_3(%arg0: i32) -> (i32, i32) {
    %c0_i32 = arith.constant 0 : i32
    %c0_i32_0 = arith.constant 0 : i32
    return %arg0, %c0_i32 : i32, i32
  }
}

</mosaic_0001>

<bundles_post_ra>
// kernel: tpu_custom_call.1
= control target key start
LH: loop header
LB: loop body
LE: loop exit
PB: predicated region body
PF: predicated region fallthrough
CT: control target
= control target key end

     0   :  { %8 = vsyncpa [#allocation3], 0  ;;  %s510_s0 = inlined_call_operand.hbm [shape: f32[8,300], index: 0, kind: input, shape index: {}]   ;;  %s511_s1 = inlined_call_operand.hbm [shape: bf16[300,128], index: 1, kind: input, shape index: {}]   ;;  %s512_s2 = inlined_call_operand.vmem [shape: f32[1,128], index: 2, kind: input, shape index: {}]   ;;  %s513_s3 = inlined_call_operand.hbm [shape: f32[8,128], index: 3, kind: output, shape index: {}]  }
   0x1   :  { %9 = vsyncpa [#allocation6], 0 }
   0x2   :  { %10 = vsyncpa [#allocation4], 0  ;;  %s471_s12 = smov [#allocation2]   ;;  %s472_s14 = smov [#allocation5]  }
   0x3   :  { %s17_s13 = sshll.u32 %s471_s12, 4  ;;  %s26_s15 = sshll.u32 %s472_s14, 4  ;;  %s18_s13 = int_to_ptr.vmem [resolvable:$true] %s17_s13  ;;  %s27_s15 = int_to_ptr.vmem [resolvable:$true] %s26_s15 }
   0x4   :  { %s413_s16 = scalar_lea.vmem %s18_s13, 384  ;;  %p418_p1 = scmp.lt.s32.totalorder %s18_s13, %s18_s13 }
   0x5   :  { %p414_p0 = scmp.ne.s32.totalorder %s18_s13, %s413_s16  ;;  %p419_p2 = scmp.lt.s32.totalorder %s413_s16, %s413_s16 }
   0x7   :  { %p420_p3 = por %p419_p2, %p418_p1 }
   0x9   :  { %p421_p4 = pnand %p420_p3, %p414_p0 }
   0xb   :  { %424 = shalt.err (!%p421_p4)
}
   0xc   :  { %20 = dma.hbm_to_vmem [thread:$0]  %s510_s0, 384, %s18_s13, [#allocation3]  }
   0xd   :  { %s433_s19 = scalar_lea.vmem %s27_s15, 2432  ;;  %p438_p6 = scmp.lt.s32.totalorder %s27_s15, %s27_s15 }
   0xe   :  { %p434_p5 = scmp.ne.s32.totalorder %s27_s15, %s433_s19  ;;  %p439_p7 = scmp.lt.s32.totalorder %s433_s19, %s433_s19 }
  0x10   :  { %p440_p8 = por %p439_p7, %p438_p6 }
  0x12   :  { %p441_p9 = pnand %p440_p8, %p434_p5 }
  0x14   :  { %444 = shalt.err (!%p441_p9)
}
  0x15   :  { %s473_s20 = smov 64   ;;  %s474_s21 = smov 4  }
  0x16   :  { %32 = dma.hbm_to_vmem [thread:$0]  %s511_s1, 2432, %s27_s15, [#allocation6], %s473_s20, %s473_s20, %s474_s21  }
  0x17   :  { %465 = dma.done.wait [#allocation3], 384  }
  0x18   :  { %466 = vsyncadd [#allocation3], 4294966912 }
  0x19   :  { %467 = dma.done.wait [#allocation6], 2432  }
  0x1a   :  { %468 = vsyncadd [#allocation6], 4294964864  ;;  %v475_v0 = vmov 0.0   ;;  %vm476_vm0 = vmmov 0   ;;  %v382_v1 = vld [vmem:[#allocation5 + $0x78] sm:$0xff]   ;;  %v384_v3 = vld [vmem:[#allocation5 + $0x70] sm:$0xff]  }
  0x1b   :  { %365 = vmatprep.subr.bf16.mxu1 %v475_v0  ;;  %371 = vmatprep.mubr.msk.bf16.mxu1 %vm476_vm0, %v475_v0  ;;  %v383_v2 = vld [vmem:[#allocation5 + $0x38] sm:$0xff]   ;;  %v385_v4 = vld [vmem:[#allocation5 + $0x30] sm:$0xff]   ;;  %v386_v5 = vld [vmem:[#allocation5 + $0x68] sm:$0xff]   ;;  %vm210_vm1 = vcmask 1045504   ;;  %vm206_vm2 = vcmask 359424   ;;  %s477_s24 = smov [#allocation7]  }
  0x1c   :  { %339 = vmatprep.subr.bf16.mxu0 %v382_v1  ;;  %v387_v6 = vld [vmem:[#allocation5 + $0x28] sm:$0xff]   ;;  %v388_v7 = vld [vmem:[#allocation5 + $0x60] sm:$0xff]   ;;  %v390_v9 = vld [vmem:[#allocation5 + $0x58] sm:$0xff]   ;;  %s307_s25 = sshll.u32 %s477_s24, 4  ;;  %s308_s25 = int_to_ptr.vmem [resolvable:$true] %s307_s25 }
  0x1d   :  { %340 = vmatpush3.bf16.msra.mxu0 %v383_v2  ;;  %v389_v8 = vld [vmem:[#allocation5 + $0x20] sm:$0xff]   ;;  %v394_v10 = vld [vmem:[#allocation5 + $0x90] sm:$0x3f]   ;;  %v391_v11 = vld [vmem:[#allocation5 + $0x18] sm:$0xff]   ;;  %s445_s26 = scalar_lea.vmem %s308_s25, 128  ;;  %p450_p11 = scmp.lt.s32.totalorder %s308_s25, %s308_s25 }
  0x1e   :  { %341 = vmatprep.subr.bf16.mxu0 %v384_v3  ;;  %v212_v12 = vsel %vm210_vm1, %v394_v10, 0  ;;  %v397_v13 = vld [vmem:[#allocation5 + $0x88] sm:$0xff]   ;;  %v392_v14 = vld [vmem:[#allocation5 + $0x50] sm:$0xff]   ;;  %v400_v16 = vld [vmem:[#allocation5 + $0x80] sm:$0xff]   ;;  %p446_p10 = scmp.ne.s32.totalorder %s308_s25, %s445_s26  ;;  %p451_p12 = scmp.lt.s32.totalorder %s445_s26, %s445_s26 }
  0x1f   :  { %366 = vmatpush3.bf16.msra.mxu1 %v212_v12  ;;  %v393_v15 = vld [vmem:[#allocation5 + $0x10] sm:$0xff]   ;;  %v44_v18 = vld [vmem:[#allocation2 + $0x10] sm:$0xff]  ;;  %v395_v19 = vld [vmem:[#allocation5 + $0x48] sm:$0xff]  }
  0x20   :  { %367 = vmatprep.subr.bf16.mxu1 %v475_v0  ;;  %v43_v17 = vld [vmem:[#allocation2 + $0x8] sm:$0xff]  ;;  %v47_v21 = vpack.c.bf16 %v44_v18, %v44_v18  ;;  %v396_v22 = vld [vmem:[#allocation5 + $0x8] sm:$0xff]   ;;  %v398_v23 = vld [vmem:[#allocation5 + $0x40] sm:$0xff]   ;;  %p452_p13 = por %p451_p12, %p450_p11 }
  0x21   :  { %342 = vmatpush3.bf16.msra.mxu0 %v385_v4  ;;  %v46_v20 = vpack.c.bf16 %v43_v17, %v43_v17  ;;  %v399_v24 = vld [vmem:[#allocation5] sm:$0xff]   ;;  %v42_v25 = vld [vmem:[#allocation2] sm:$0xff] }
  0x22   :  { %343 = vmatprep.subr.bf16.mxu0 %v386_v5  ;;  %v45_v26 = vpack.c.bf16 %v42_v25, %v42_v25  ;;  %v317_v32 = vld [vmem:[%s512_s2] ss:$0 sm:$0xff]  ;;  %p453_p0 = pnand %p452_p13, %p446_p10 }
  0x23   :  { %368 = vmatpush3.bf16.msra.mxu1 %v397_v13  ;;  %246 = vmatprep.mubr.bf16.mxu0 %v46_v20 }
  0x24   :  { %369 = vmatprep.subr.bf16.mxu1 %v475_v0 }
  0x25   :  { %344 = vmatpush3.bf16.msra.mxu0 %v387_v6 }
  0x26   :  { %345 = vmatprep.subr.bf16.mxu0 %v388_v7 }
  0x27   :  { %370 = vmatpush3.bf16.msra.mxu1 %v400_v16 }
  0x29   :  { %346 = vmatpush3.bf16.msra.mxu0 %v389_v8 }
  0x2a   :  { %347 = vmatprep.subr.bf16.mxu0 %v390_v9  ;;  %372 = vmatmul.mubr.msk.bf16.vlgmr.msra.gmra.mxu1 %vm206_vm2, %v47_v21 }
  0x2d   :  { %348 = vmatpush3.bf16.msra.mxu0 %v391_v11 }
  0x2e   :  { %349 = vmatprep.subr.bf16.mxu0 %v392_v14 }
  0x31   :  { %350 = vmatpush3.bf16.msra.mxu0 %v393_v15 }
  0x32   :  { %351 = vmatprep.subr.bf16.mxu0 %v395_v19 }
  0x35   :  { %352 = vmatpush3.bf16.msra.mxu0 %v396_v22 }
  0x36   :  { %353 = vmatprep.subr.bf16.mxu0 %v398_v23 }
  0x39   :  { %354 = vmatpush3.bf16.msra.mxu0 %v399_v24 }
  0x3c   :  { %247 = vmatmul.mubr.bf16.vlgmr.msra.gmra.mxu0 %v45_v26 }
  0xea   :  { %v288_v27 = vpop.f32.mrf.mxu1 }
  0xec   :  { %v373_v28 = vpop.f32.mrf.mxu1 }
  0xee   :  { %v291_v29 = vpop.f32.mrf.mxu1 }
  0xf0   :  { %v374_v30 = vpop.f32.mrf.mxu1 }
  0xfc   :  { %v355_v31 = vpop.f32.mrf.mxu0 }
  0xfe   :  { %v356_v33 = vpop.f32.mrf.mxu0 }
  0xff   :  { %v357_v34 = vadd.f32 %v356_v33, %v355_v31 }
 0x100   :  { %v358_v35 = vpop.f32.mrf.mxu0 }
 0x101   :  { %v249_v36 = vadd.f32 %v357_v34, %v317_v32 }
 0x102   :  { %v359_v37 = vpop.f32.mrf.mxu0 }
 0x103   :  { %v289_v38 = vadd.f32 %v288_v27, %v249_v36 }
 0x105   :  { %v338_v39 = vmul.f32 -1.442695, %v289_v38 }
 0x107   :  { %401 = vpow2.f32 %v338_v39 }
 0x114   :  { %v402_v40 = vpop.eup %401 }
 0x115   :  { %v297_v41 = vadd.f32 1.0, %v402_v40 }
 0x117   :  { %403 = vrcp.f32 %v297_v41 }
 0x124   :  { %v404_v42 = vpop.eup %403 }
 0x125   :  { %300 = vst [vmem:[#allocation7] sm:$0xff] %v404_v42 }
 0x126   :  { %456 = shalt.err (!%p453_p0)
}
 0x127   :  { %310 = dma.vmem_to_hbm [thread:$0]  %s308_s25, 128, %s513_s3, [#allocation4]  }
 0x128   :  { %469 = dma.done.wait [#allocation4], 128  }
 0x129   :  { %470 = vsyncadd [#allocation4], 4294967168 }
 0x12a   :  { %314 = vsyncpa [#allocation3], 1 }
 0x12b   :  { %315 = vsyncpa [#allocation6], 1 }
 0x12c   :  { %316 = vsyncpa [#allocation4], 1 }

</bundles_post_ra>
